<compile_context>
chip_gen: v6e
topology: v6e:2x2x1
jax: 0.10.0
libtpu: 0.0.40
codegen_flags: <defaults>
</compile_context>

<pallas_src>
import jax
import jax.numpy as jnp
from jax import lax
from jax.experimental import pallas as pl
from jax.experimental.pallas import tpu as pltpu


def _round_up(a, m):
    return ((a + m - 1) // m) * m


def _cdiv(a, b):
    return (a + b - 1) // b


def _vmem_capacity_bytes():
    try:
        cap = int(pltpu.get_tpu_info().vmem_capacity_bytes)
        if cap > 0:
            return cap
    except Exception:
        pass
    return 64 * 1024 * 1024          # conservative (v7x-sized) fallback


def domain_transform(x, weight, bias):
    """Forward of Domain_transform. x: (N,C,H,W); weight: (1,C); bias: (1,). -> scalar f32."""
    x = jax.lax.stop_gradient(x)                     # x.detach().data
    n, c, h, w_sp = x.shape
    hw = h * w_sp
    rows = n * c
    x2 = x.reshape(rows, hw)                         # contiguous reshape: no HBM copy
    itemsize = jnp.dtype(x.dtype).itemsize

    # ---- generation-aware block budget (bigger blocks where VMEM allows) ----
    vmem_cap = _vmem_capacity_bytes()
    block_budget = min(16 * 1024 * 1024, max(2 * 1024 * 1024, vmem_cap // 8))
    vmem_limit = min(vmem_cap * 3 // 4, 3 * block_budget + 24 * 1024 * 1024)

    # ---- row (sublane) tiling over the flattened N*C axis ----
    row_tile = rows if rows <= 1024 else 1024        # 1024 % {8,16,32} == 0
    row_tiles = _cdiv(rows, row_tile)

    # ---- hw (lane / streaming) tiling ----
    chunk = min(512, _round_up(hw, 128))             # accumulator lane width
    max_hw_by_budget = max(
        chunk, (block_budget // max(1, row_tile * itemsize)) // chunk * chunk)
    hw_tile = min(_round_up(hw, chunk), max_hw_by_budget)
    hw_tiles_total = _cdiv(hw, hw_tile)
    nchunks = hw_tile // chunk
    unroll = max(1, min(nchunks, 8))

    # 2-way split of the reduction axis so small-batch inputs can still engage
    # the second TensorCore on v7x (harmless elsewhere: just a size-2 axis).
    split = 2 if (row_tiles == 1 and hw_tiles_total >= 2) else 1
    hw_tiles_ps = _cdiv(hw_tiles_total, split)

    def kernel(x_ref, o_ref, acc_ref):
        s = pl.program_id(0)
        j = pl.program_id(2)

        @pl.when(j == 0)
        def _init():
            acc_ref[...] = jnp.zeros_like(acc_ref)

        lblk = s * hw_tiles_ps + j                   # logical hw block index
        base = lblk * hw_tile                        # element offset in HW
        full = base + hw_tile <= hw                  # every lane of this block valid

        # streamed phase: pure vld + vadd into the lane-dense accumulator
        @pl.when(full)
        def _fast():
            def body(t, carry):
                start = pl.multiple_of(t * chunk, chunk)
                acc_ref[...] += x_ref[:, pl.ds(start, chunk)].astype(jnp.float32)
                return carry
            lax.fori_loop(0, nchunks, body, 0, unroll=unroll)

        # boundary blocks only: mask ragged / out-of-range lanes (no double count)
        @pl.when(jnp.logical_not(full))
        def _masked():
            lane = lax.broadcasted_iota(jnp.int32, (row_tile, chunk), 1)

            def body(t, carry):
                start = pl.multiple_of(t * chunk, chunk)
                xb = x_ref[:, pl.ds(start, chunk)].astype(jnp.float32)
                valid = (base + start + lane) < hw
                acc_ref[...] += jnp.where(valid, xb, 0.0)
                return carry
            lax.fori_loop(0, nchunks, body, 0, unroll=unroll)

        # finalize once per (split, row-tile): single cross-lane reduce (XLU)
        @pl.when(j == hw_tiles_ps - 1)
        def _fin():
            o_ref[...] = jnp.sum(acc_ref[...], axis=-1, keepdims=True)

    cost = pl.CostEstimate(
        flops=rows * hw,
        transcendentals=0,
        bytes_accessed=rows * hw * itemsize + split * rows * 4,
    )

    part = pl.pallas_call(
        kernel,
        out_shape=jax.ShapeDtypeStruct((split, rows, 1), jnp.float32),
        grid=(split, row_tiles, hw_tiles_ps),
        in_specs=[
            pl.BlockSpec(
                (row_tile, hw_tile),
                lambda s, i, j: (i, jnp.minimum(s * hw_tiles_ps + j,
                                                hw_tiles_total - 1)),
            ),
        ],
        out_specs=pl.BlockSpec((None, row_tile, 1), lambda s, i, j: (s, i, 0)),
        scratch_shapes=[pltpu.VMEM((row_tile, chunk), jnp.float32)],
        compiler_params=pltpu.CompilerParams(
            dimension_semantics=("parallel", "parallel", "arbitrary"),
            vmem_limit_bytes=int(vmem_limit),
        ),
        cost_estimate=cost,
    )(x2)

    # Tiny epilogue in plain JAX on (N, C) scalars: combine split partials,
    # fold 1/(H*W) into the weight, C->1 weighting, bias, ReLU, batch mean.
    sums = jnp.sum(part[:, :, 0], axis=0).reshape(n, c)      # raw spatial sums
    w_scaled = weight.reshape(c).astype(jnp.float32) * (1.0 / float(hw))
    y = sums @ w_scaled + bias.reshape(()).astype(jnp.float32)
    y = jnp.maximum(y, 0.0)
    return jnp.mean(y)


def reference(x, weight, bias):
    pooled = jnp.mean(x, axis=(2, 3))                # (N, C)
    y = pooled @ weight.T + bias                     # (N, 1)
    y = jnp.maximum(y, 0.0)
    return jnp.mean(y)


if __name__ == "__main__":
    key = jax.random.PRNGKey(0)
    k_x, k_w, k_b = jax.random.split(key, 3)

    N, C, H, W = 2, 4, 16, 16                        # planes = C = 4
    x = jax.random.normal(k_x, (N, C, H, W), dtype=jnp.float32)

    # Deterministic Linear(planes, 1) parameters (synthetic init).
    bound = 1.0 / (C ** 0.5)
    weight = jax.random.uniform(k_w, (1, C), minval=-bound, maxval=bound,
                                dtype=jnp.float32)
    bias = jax.random.uniform(k_b, (1,), minval=-bound, maxval=bound,
                              dtype=jnp.float32)

    out = domain_transform(x, weight, bias)
    out = jax.block_until_ready(out)

    ref = reference(x, weight, bias)
    assert jnp.allclose(out, ref, atol=1e-5, rtol=1e-5), (out, ref)
    print("KERNEL_OK")
</pallas_src>

<mosaic_0001>
module attributes {stable_mosaic.version = 11 : i64} {
  func.func @kernel(%arg0: i32, %arg1: i32, %arg2: i32, %arg3: memref<8x256xf32, #tpu.memory_space<vmem>>, %arg4: memref<1x8x1xf32, #tpu.memory_space<vmem>>, %arg5: memref<8x256xf32, #tpu.memory_space<vmem>>) attributes {dimension_semantics = [#tpu.dimension_semantics<parallel>, #tpu.dimension_semantics<parallel>, #tpu.dimension_semantics<arbitrary>], iteration_bounds = array<i64: 1, 1, 1>, scalar_prefetch = 0 : i64, scratch_operands = 1 : i64, tpu.core_type = #tpu.core_type<tc>, window_params = [{transform_indices = @transform_0, window_bounds = array<i64: 8, 256>}, {transform_indices = @transform_1, window_bounds = array<i64: 1, 8, 1>}]} {
    %c0_i32 = arith.constant 0 : i32
    %0 = arith.cmpi eq, %arg2, %c0_i32 : i32
    %1 = arith.extui %0 : i1 to i32
    %c0_i32_0 = arith.constant 0 : i32
    %2 = arith.cmpi ne, %1, %c0_i32_0 : i32
    scf.if %2 {
      %cst = arith.constant 0.000000e+00 : f32
      %16 = vector.broadcast %cst : f32 to vector<8x256xf32>
      %c0 = arith.constant 0 : index
      %c0_7 = arith.constant 0 : index
      %17 = vector.load %arg5[%c0, %c0_7] : memref<8x256xf32, #tpu.memory_space<vmem>>, vector<8x256xf32>
      tpu.vector_store %arg5[%c0, %c0_7], %16 {strides = array<i32>} : memref<8x256xf32, #tpu.memory_space<vmem>>, vector<8x256xf32>,
    } else {
    }
    %c1_i32 = arith.constant 1 : i32
    %3 = arith.muli %arg0, %c1_i32 : i32
    %4 = arith.addi %3, %arg2 : i32
    %c256_i32 = arith.constant 256 : i32
    %5 = arith.muli %4, %c256_i32 : i32
    %c256_i32_1 = arith.constant 256 : i32
    %6 = arith.addi %5, %c256_i32_1 : i32
    %c256_i32_2 = arith.constant 256 : i32
    %7 = arith.cmpi sle, %6, %c256_i32_2 : i32
    %8 = arith.extui %7 : i1 to i32
    %c0_i32_3 = arith.constant 0 : i32
    %9 = arith.cmpi ne, %8, %c0_i32_3 : i32
    scf.if %9 {
      %c0_i32_7 = arith.constant 0 : i32
      %c256_i32_8 = arith.constant 256 : i32
      %16 = arith.muli %c0_i32_7, %c256_i32_8 : i32
      %17 = tpu.assume_multiple %16, 256 : i32
      %c0 = arith.constant 0 : index
      %c0_9 = arith.constant 0 : index
      %18 = vector.load %arg5[%c0, %c0_9] : memref<8x256xf32, #tpu.memory_space<vmem>>, vector<8x256xf32>
      %c0_10 = arith.constant 0 : index
      %19 = arith.index_cast %17 : i32 to index
      %20 = vector.load %arg3[%c0_10, %19] : memref<8x256xf32, #tpu.memory_space<vmem>>, vector<8x256xf32>
      %21 = arith.addf %18, %20 : vector<8x256xf32>
      %c0_11 = arith.constant 0 : index
      %c0_12 = arith.constant 0 : index
      %22 = vector.load %arg5[%c0_11, %c0_12] : memref<8x256xf32, #tpu.memory_space<vmem>>, vector<8x256xf32>
      tpu.vector_store %arg5[%c0_11, %c0_12], %21 {strides = array<i32>} : memref<8x256xf32, #tpu.memory_space<vmem>>, vector<8x256xf32>,
      %c1_i32_13 = arith.constant 1 : i32
    } else {
    }
    %true = arith.constant true
    %10 = arith.xori %7, %true : i1
    %11 = arith.extui %10 : i1 to i32
    %c0_i32_4 = arith.constant 0 : i32
    %12 = arith.cmpi ne, %11, %c0_i32_4 : i32
    scf.if %12 {
      %16 = tpu.iota {dimensions = array<i32: 1>} : vector<8x256xi32>
      %c0_i32_7 = arith.constant 0 : i32
      %c256_i32_8 = arith.constant 256 : i32
      %17 = arith.muli %c0_i32_7, %c256_i32_8 : i32
      %18 = tpu.assume_multiple %17, 256 : i32
      %c0 = arith.constant 0 : index
      %19 = arith.index_cast %18 : i32 to index
      %20 = vector.load %arg3[%c0, %19] : memref<8x256xf32, #tpu.memory_space<vmem>>, vector<8x256xf32>
      %21 = arith.addi %5, %18 : i32
      %22 = vector.broadcast %21 : i32 to vector<8x256xi32>
      %23 = arith.addi %22, %16 : vector<8x256xi32>
      %c256_i32_9 = arith.constant 256 : i32
      %24 = vector.broadcast %c256_i32_9 : i32 to vector<8x256xi32>
      %25 = arith.cmpi slt, %23, %24 : vector<8x256xi32>
      %c0_10 = arith.constant 0 : index
      %c0_11 = arith.constant 0 : index
      %26 = vector.load %arg5[%c0_10, %c0_11] : memref<8x256xf32, #tpu.memory_space<vmem>>, vector<8x256xf32>
      %cst = arith.constant 0.000000e+00 : f32
      %27 = vector.broadcast %cst : f32 to vector<8x256xf32>
      %28 = arith.select %25, %20, %27 : vector<8x256xi1>, vector<8x256xf32>
      %29 = arith.addf %26, %28 : vector<8x256xf32>
      %c0_12 = arith.constant 0 : index
      %c0_13 = arith.constant 0 : index
      %30 = vector.load %arg5[%c0_12, %c0_13] : memref<8x256xf32, #tpu.memory_space<vmem>>, vector<8x256xf32>
      tpu.vector_store %arg5[%c0_12, %c0_13], %29 {strides = array<i32>} : memref<8x256xf32, #tpu.memory_space<vmem>>, vector<8x256xf32>,
      %c1_i32_14 = arith.constant 1 : i32
    } else {
    }
    %c0_i32_5 = arith.constant 0 : i32
    %13 = arith.cmpi eq, %arg2, %c0_i32_5 : i32
    %14 = arith.extui %13 : i1 to i32
    %c0_i32_6 = arith.constant 0 : i32
    %15 = arith.cmpi ne, %14, %c0_i32_6 : i32
    scf.if %15 {
      %c0 = arith.constant 0 : index
      %c0_7 = arith.constant 0 : index
      %16 = vector.load %arg5[%c0, %c0_7] : memref<8x256xf32, #tpu.memory_space<vmem>>, vector<8x256xf32>
      %cst = arith.constant dense<0.000000e+00> : vector<8xf32>
      %17 = vector.multi_reduction <add>, %16, %cst [1] : vector<8x256xf32> to vector<8xf32>
      %18 = vector.shape_cast %17 : vector<8xf32> to vector<8x1xf32>
      %c0_8 = arith.constant 0 : index
      %c0_9 = arith.constant 0 : index
      %c0_10 = arith.constant 0 : index
      %19 = vector.load %arg4[%c0_8, %c0_9, %c0_10] : memref<1x8x1xf32, #tpu.memory_space<vmem>>, vector<1x8x1xf32>
      %20 = vector.shape_cast %19 : vector<1x8x1xf32> to vector<8x1xf32>
      %21 = vector.shape_cast %18 : vector<8x1xf32> to vector<1x8x1xf32>
      tpu.vector_store %arg4[%c0_8, %c0_9, %c0_10], %21 {strides = array<i32>} : memref<1x8x1xf32, #tpu.memory_space<vmem>>, vector<1x8x1xf32>,
    } else {
    }
    return
  }
  func.func @transform_0(%arg0: i32, %arg1: i32, %arg2: i32) -> (i32, i32) {
    %c1_i32 = arith.constant 1 : i32
    %0 = arith.muli %arg0, %c1_i32 : i32
    %1 = arith.addi %0, %arg2 : i32
    %c0_i32 = arith.constant 0 : i32
    %2 = arith.minsi %1, %c0_i32 : i32
    %c0_i32_0 = arith.constant 0 : i32
    return %arg1, %2 : i32, i32
  }
  func.func @transform_1(%arg0: i32, %arg1: i32, %arg2: i32) -> (i32, i32, i32) {
    %c0_i32 = arith.constant 0 : i32
    %c0_i32_0 = arith.constant 0 : i32
    return %arg0, %arg1, %c0_i32 : i32, i32, i32
  }
}

</mosaic_0001>

<bundles_post_ra>
// kernel: tpu_custom_call.1
= control target key start
LH: loop header
LB: loop body
LE: loop exit
PB: predicated region body
PF: predicated region fallthrough
CT: control target
= control target key end

     0   :  { %6 = vsyncpa [#allocation4], 0  ;;  %s114_s6 = smov [#allocation3]   ;;  %s131_s0 = inlined_call_operand.hbm [shape: f32[8,256], index: 0, kind: input, shape index: {}]   ;;  %s132_s1 = inlined_call_operand.vmem [shape: f32[1,8,1], index: 1, kind: output, shape index: {}]  }
   0x1   :  { %s19_s7 = sshll.u32 %s114_s6, 4  ;;  %s20_s7 = int_to_ptr.vmem [resolvable:$true] %s19_s7 }
   0x2   :  { %s100_s8 = scalar_lea.vmem %s20_s7, 256  ;;  %p105_p1 = scmp.lt.s32.totalorder %s20_s7, %s20_s7 }
   0x3   :  { %p101_p0 = scmp.ne.s32.totalorder %s20_s7, %s100_s8  ;;  %p106_p2 = scmp.lt.s32.totalorder %s100_s8, %s100_s8 }
   0x5   :  { %p107_p3 = por %p106_p2, %p105_p1 }
   0x7   :  { %p108_p4 = pnand %p107_p3, %p101_p0 }
   0x9   :  { %111 = shalt.err (!%p108_p4)
}
   0xa   :  { %22 = dma.hbm_to_vmem [thread:$0]  %s131_s0, 256, %s20_s7, [#allocation4]  }
   0xb   :  { %112 = dma.done.wait [#allocation4], 256  }
   0xc   :  { %113 = vsyncadd [#allocation4], 4294967040  ;;  %v45_v0 = vld [vmem:[#allocation3] sm:$0xff]  ;;  %v46_v1 = vld [vmem:[#allocation3 + $0x8] sm:$0xff]  ;;  %vm82_vm0 = vcmask 7168  }
   0xd   :  { %v79_v2 = vadd.f32 %v46_v1, %v45_v0 }
   0xf   :  { %80 = vadd.xlane.f32.xlu0 %v79_v2 }
  0x98   :  { %v81_v3 = vpop.xlane.xlu0 %80 }
  0x99   :  { %83 = vst.msk [vmem:[%s132_s1] sm:$0xff] %vm82_vm0, %v81_v3 }
  0x9a   :  { %88 = vsyncpa [#allocation4], 1 }

</bundles_post_ra>
